<compile_context>
chip_gen: v6e
topology: v6e:2x2x1
jax: 0.10.0
libtpu: 0.0.40
codegen_flags: <defaults>
</compile_context>

<pallas_src>
import functools

import jax
import jax.numpy as jnp
from jax import lax
from jax.experimental import pallas as pl
from jax.experimental.pallas import tpu as pltpu


def _attention_head_kernel(x_ref, wq_ref, wk_ref, wv_ref, bq_ref, bv_ref,
                           wproj_ref, bproj_ref, o_ref, acc_ref, *, scale):
    # x_ref:     (N, C)      wq/wk/wv_ref: (C, D) bf16    bq/bv_ref: (1, D) f32
    # wproj_ref: (D, C) bf16 bproj_ref: (1, C) f32
    # o_ref:     (N, C)      acc_ref: (N, C) f32 VMEM scratch
    h = pl.program_id(1)
    num_heads = pl.num_programs(1)

    @pl.when(h == 0)
    def _init():
        # Start the accumulator at the projection bias (added once).
        acc_ref[...] = jnp.broadcast_to(
            bproj_ref[...].astype(jnp.float32), acc_ref.shape)

    xb = x_ref[...].astype(jnp.bfloat16)                              # (N, C)

    # Per-head projections (bf16 MXU operands, f32 accumulation).
    q = jnp.dot(xb, wq_ref[...], preferred_element_type=jnp.float32)
    q = (q + bq_ref[...]) * scale                                      # (N, D)
    k = jnp.dot(xb, wk_ref[...], preferred_element_type=jnp.float32)   # (N, D)
    v = jnp.dot(xb, wv_ref[...], preferred_element_type=jnp.float32)
    v = v + bv_ref[...]                                                # (N, D)

    # Scores: q @ k^T (contract the head dim), f32 softmax math.
    s = lax.dot_general(q.astype(jnp.bfloat16), k.astype(jnp.bfloat16),
                        (((1,), (1,)), ((), ())),
                        preferred_element_type=jnp.float32)            # (N, N)
    s = s - jnp.max(s, axis=-1, keepdims=True)
    p = jnp.exp(s)                                                     # (N, N)
    l = jnp.sum(p, axis=-1, keepdims=True)                             # (N, 1)

    # Deferred normalization: (P @ V) * 1/l  instead of normalizing P.
    pv = jnp.dot(p.astype(jnp.bfloat16), v.astype(jnp.bfloat16),
                 preferred_element_type=jnp.float32)                   # (N, D)
    o_h = pv * pl.reciprocal(l, approx=True)                           # (N, D)

    # Per-head output projection, accumulated lane-dense into (N, C).
    acc_ref[...] += jnp.dot(o_h.astype(jnp.bfloat16), wproj_ref[...],
                            preferred_element_type=jnp.float32)        # (N, C)

    @pl.when(h == num_heads - 1)
    def _writeback():
        o_ref[...] = acc_ref[...].astype(o_ref.dtype)


def prepare_attention_params(w_qkv, q_bias, v_bias, w_proj, b_proj, num_heads,
                             mxu_dtype=jnp.bfloat16):
    """One-time weight packing (do this OUTSIDE the per-step hot path).

    w_qkv: (3*AHD, C) PyTorch layout; w_proj: (C, AHD); biases 1-D or None.
    Returns per-head, lane-dense, bf16 weight slabs plus f32 biases.
    """
    three_ahd, C = w_qkv.shape
    ahd = three_ahd // 3
    assert ahd % num_heads == 0
    D = ahd // num_heads

    wq = w_qkv[:ahd]          # (AHD, C)
    wk = w_qkv[ahd:2 * ahd]
    wv = w_qkv[2 * ahd:]

    def per_head_t(w):        # (AHD, C) -> (H, C, D), i.e. per-head W^T slices
        return jnp.transpose(w.reshape(num_heads, D, C), (0, 2, 1)).astype(mxu_dtype)

    wq_h = per_head_t(wq)
    wk_h = per_head_t(wk)
    wv_h = per_head_t(wv)

    # W_proj^T is (AHD, C); head h owns rows h*D:(h+1)*D -> (H, D, C).
    wproj_h = jnp.transpose(w_proj.reshape(C, num_heads, D), (1, 2, 0)).astype(mxu_dtype)

    # qkv bias = cat(q_bias, zeros, v_bias) as in the PyTorch module; guard
    # the None cases independently.
    if q_bias is None:
        qb = jnp.zeros((ahd,), jnp.float32)
    else:
        qb = q_bias.astype(jnp.float32)
    if v_bias is None:
        vb = jnp.zeros((ahd,), jnp.float32)
    else:
        vb = v_bias.astype(jnp.float32)
    bq_h = qb.reshape(num_heads, 1, D)
    bv_h = vb.reshape(num_heads, 1, D)

    bproj2d = b_proj.reshape(1, C).astype(jnp.float32)

    return (wq_h, wk_h, wv_h, bq_h, bv_h, wproj_h, bproj2d)


def attention_forward(x, params, num_heads, qk_scale=None):
    """x: (B, N, C); params from prepare_attention_params."""
    wq_h, wk_h, wv_h, bq_h, bv_h, wproj_h, bproj2d = params
    B, N, C = x.shape
    H = num_heads
    D = wq_h.shape[-1]
    scale = float(qk_scale) if qk_scale is not None else float(D) ** (-0.5)

    kernel = functools.partial(_attention_head_kernel, scale=scale)

    # --- VMEM budget from the actual block sizes (double-buffered inputs,
    # resident output block, scratch, in-kernel temporaries) -----------------
    bpe_x = jnp.dtype(x.dtype).itemsize
    bpe_w = jnp.dtype(wq_h.dtype).itemsize
    w_blocks = 2 * (3 * C * D + D * C) * bpe_w              # wq/wk/wv/wproj, 2 bufs
    b_blocks = 2 * (2 * D + C) * 4                           # biases, 2 bufs
    xo_blocks = 2 * 2 * N * C * bpe_x                        # x + out, 2 bufs each
    acc_block = N * C * 4                                    # f32 scratch
    work = N * N * 4 + 6 * N * D * 4 + N * C * 4             # scores, q/k/v/pv, proj
    vmem_est = w_blocks + b_blocks + xo_blocks + acc_block + work
    vmem_limit = int(min(64 * 1024 * 1024, max(4 * 1024 * 1024, 2 * vmem_est)))

    flops_per_bh = (6 * N * C * D        # q/k/v projections
                    + 2 * N * N * D      # q @ k^T
                    + 2 * N * N * D      # p @ v
                    + 2 * N * D * C)     # output projection
    cost = pl.CostEstimate(
        flops=int(B * H * flops_per_bh),
        transcendentals=int(B * H * (N * N + N)),            # exp + reciprocal
        bytes_accessed=int(bpe_x * (x.size + B * N * C)
                           + bpe_w * (wq_h.size + wk_h.size + wv_h.size + wproj_h.size)
                           + 4 * (bq_h.size + bv_h.size + bproj2d.size)),
    )

    grid_spec = pltpu.PrefetchScalarGridSpec(
        num_scalar_prefetch=0,
        grid=(B, H),
        in_specs=[
            pl.BlockSpec((None, N, C), lambda b, h: (b, 0, 0)),   # x (resident over h)
            pl.BlockSpec((None, C, D), lambda b, h: (h, 0, 0)),   # W_q^T head slice
            pl.BlockSpec((None, C, D), lambda b, h: (h, 0, 0)),   # W_k^T head slice
            pl.BlockSpec((None, C, D), lambda b, h: (h, 0, 0)),   # W_v^T head slice
            pl.BlockSpec((None, 1, D), lambda b, h: (h, 0, 0)),   # q bias head slice
            pl.BlockSpec((None, 1, D), lambda b, h: (h, 0, 0)),   # v bias head slice
            pl.BlockSpec((None, D, C), lambda b, h: (h, 0, 0)),   # W_proj^T head slice
            pl.BlockSpec((1, C), lambda b, h: (0, 0)),            # proj bias
        ],
        out_specs=pl.BlockSpec((None, N, C), lambda b, h: (b, 0, 0)),
        scratch_shapes=[pltpu.VMEM((N, C), jnp.float32)],
    )

    return pl.pallas_call(
        kernel,
        out_shape=jax.ShapeDtypeStruct((B, N, C), x.dtype),
        grid_spec=grid_spec,
        compiler_params=pltpu.CompilerParams(
            dimension_semantics=("parallel", "arbitrary"),
            vmem_limit_bytes=vmem_limit,
        ),
        cost_estimate=cost,
    )(x, wq_h, wk_h, wv_h, bq_h, bv_h, wproj_h, bproj2d)


def _reference_attention(x, w_qkv, q_bias, v_bias, w_proj, b_proj,
                         num_heads, qk_scale=None):
    """Pure-JAX f32 reference mirroring the PyTorch Attention.forward default path."""
    B, N, C = x.shape
    three_ahd = w_qkv.shape[0]
    ahd = three_ahd // 3
    head_dim = ahd // num_heads
    scale = qk_scale if qk_scale is not None else head_dim ** (-0.5)

    if q_bias is not None:
        vb = v_bias if v_bias is not None else jnp.zeros((ahd,), x.dtype)
        bias = jnp.concatenate([q_bias, jnp.zeros_like(vb), vb])
    else:
        bias = jnp.zeros((three_ahd,), x.dtype)

    qkv = jnp.einsum("bnc,oc->bno", x, w_qkv) + bias            # (B, N, 3*AHD)
    qkv = qkv.reshape(B, N, 3, num_heads, head_dim).transpose(2, 0, 3, 1, 4)
    q, k, v = qkv[0], qkv[1], qkv[2]                            # (B, H, N, D)
    q = q * scale
    attn = jnp.einsum("bhqd,bhkd->bhqk", q, k)
    attn = jax.nn.softmax(attn, axis=-1)
    out = jnp.einsum("bhqk,bhkd->bhqd", attn, v)                # (B, H, N, D)
    out = out.transpose(0, 2, 1, 3).reshape(B, N, ahd)
    out = jnp.einsum("bna,ca->bnc", out, w_proj) + b_proj
    return out


if __name__ == "__main__":
    # Small shapes consistent with the module: B=2, seq N=8, dim C=32,
    # num_heads=4 -> head_dim=8, all_head_dim=32, qkv_bias=True.
    B, N, C = 2, 8, 32
    num_heads = 4
    ahd = C

    key = jax.random.PRNGKey(0)
    ks = jax.random.split(key, 6)
    x = jax.random.normal(ks[0], (B, N, C), dtype=jnp.float32)
    w_qkv = jax.random.normal(ks[1], (3 * ahd, C), dtype=jnp.float32) * 0.05
    q_bias = jax.random.normal(ks[2], (ahd,), dtype=jnp.float32) * 0.05
    v_bias = jax.random.normal(ks[3], (ahd,), dtype=jnp.float32) * 0.05
    w_proj = jax.random.normal(ks[4], (C, ahd), dtype=jnp.float32) * 0.05
    b_proj = jax.random.normal(ks[5], (C,), dtype=jnp.float32) * 0.05

    # One-time weight packing (outside the hot path).
    params = prepare_attention_params(w_qkv, q_bias, v_bias, w_proj, b_proj,
                                      num_heads)

    out = attention_forward(x, params, num_heads)
    out = jax.block_until_ready(out)

    ref = _reference_attention(x, w_qkv, q_bias, v_bias, w_proj, b_proj,
                               num_heads)
    assert out.shape == (B, N, C), out.shape
    # bf16 MXU operands + approx reciprocal -> looser tolerance vs f32 reference.
    assert jnp.allclose(out, ref, atol=2e-2, rtol=2e-2), (
        "mismatch vs reference, max abs err = "
        f"{float(jnp.max(jnp.abs(out - ref)))}")

    print("KERNEL_OK")
</pallas_src>

<mosaic_0001>
module attributes {stable_mosaic.version = 11 : i64} {
  func.func @_attention_head_kernel(%arg0: i32, %arg1: i32, %arg2: memref<1x8x32xf32, #tpu.memory_space<vmem>>, %arg3: memref<1x32x8xbf16, #tpu.memory_space<vmem>>, %arg4: memref<1x32x8xbf16, #tpu.memory_space<vmem>>, %arg5: memref<1x32x8xbf16, #tpu.memory_space<vmem>>, %arg6: memref<1x1x8xf32, #tpu.memory_space<vmem>>, %arg7: memref<1x1x8xf32, #tpu.memory_space<vmem>>, %arg8: memref<1x8x32xbf16, #tpu.memory_space<vmem>>, %arg9: memref<1x32xf32, #tpu.memory_space<vmem>>, %arg10: memref<1x8x32xf32, #tpu.memory_space<vmem>>, %arg11: memref<8x32xf32, #tpu.memory_space<vmem>>) attributes {dimension_semantics = [#tpu.dimension_semantics<parallel>, #tpu.dimension_semantics<arbitrary>], iteration_bounds = array<i64: 2, 4>, scalar_prefetch = 0 : i64, scratch_operands = 1 : i64, tpu.core_type = #tpu.core_type<tc>, window_params = [{transform_indices = @transform_0, window_bounds = array<i64: 1, 8, 32>}, {transform_indices = @transform_1, window_bounds = array<i64: 1, 32, 8>}, {transform_indices = @transform_2, window_bounds = array<i64: 1, 32, 8>}, {transform_indices = @transform_3, window_bounds = array<i64: 1, 32, 8>}, {transform_indices = @transform_4, window_bounds = array<i64: 1, 1, 8>}, {transform_indices = @transform_5, window_bounds = array<i64: 1, 1, 8>}, {transform_indices = @transform_6, window_bounds = array<i64: 1, 8, 32>}, {pipeline_mode = #tpu.pipeline_mode<synchronous>, transform_indices = @transform_7, window_bounds = array<i64: 1, 32>}, {transform_indices = @transform_8, window_bounds = array<i64: 1, 8, 32>}]} {
    %c0_i32 = arith.constant 0 : i32
    %0 = arith.cmpi eq, %arg1, %c0_i32 : i32
    %1 = arith.extui %0 : i1 to i32
    %c0_i32_0 = arith.constant 0 : i32
    %2 = arith.cmpi ne, %1, %c0_i32_0 : i32
    scf.if %2 {
      %c0_34 = arith.constant 0 : index
      %c0_35 = arith.constant 0 : index
      %51 = vector.load %arg9[%c0_34, %c0_35] : memref<1x32xf32, #tpu.memory_space<vmem>>, vector<1x32xf32>
      %52 = vector.shape_cast %51 : vector<1x32xf32> to vector<1x32xf32>
      %53 = vector.broadcast %52 : vector<1x32xf32> to vector<8x32xf32>
      %c0_36 = arith.constant 0 : index
      %c0_37 = arith.constant 0 : index
      %54 = vector.load %arg11[%c0_36, %c0_37] : memref<8x32xf32, #tpu.memory_space<vmem>>, vector<8x32xf32>
      tpu.vector_store %arg11[%c0_36, %c0_37], %53 {strides = array<i32>} : memref<8x32xf32, #tpu.memory_space<vmem>>, vector<8x32xf32>,
    } else {
    }
    %c0 = arith.constant 0 : index
    %c0_1 = arith.constant 0 : index
    %c0_2 = arith.constant 0 : index
    %3 = vector.load %arg2[%c0, %c0_1, %c0_2] : memref<1x8x32xf32, #tpu.memory_space<vmem>>, vector<1x8x32xf32>
    %4 = vector.shape_cast %3 : vector<1x8x32xf32> to vector<8x32xf32>
    %5 = arith.truncf %4 : vector<8x32xf32> to vector<8x32xbf16>
    %c0_3 = arith.constant 0 : index
    %c0_4 = arith.constant 0 : index
    %c0_5 = arith.constant 0 : index
    %6 = vector.load %arg3[%c0_3, %c0_4, %c0_5] : memref<1x32x8xbf16, #tpu.memory_space<vmem>>, vector<1x32x8xbf16>
    %7 = vector.shape_cast %6 : vector<1x32x8xbf16> to vector<32x8xbf16>
    %cst = arith.constant dense<0.000000e+00> : vector<8x8xf32>
    %8 = tpu.matmul %5, %7, %cst {dimension_numbers = #tpu.dot_dimension_numbers<[1], [0], [0], [1], [0, 0, 1, 1], [], []>} : vector<8x32xbf16>, vector<32x8xbf16>, vector<8x8xf32> -> vector<8x8xf32>
    %c0_6 = arith.constant 0 : index
    %c0_7 = arith.constant 0 : index
    %c0_8 = arith.constant 0 : index
    %9 = vector.load %arg6[%c0_6, %c0_7, %c0_8] : memref<1x1x8xf32, #tpu.memory_space<vmem>>, vector<1x1x8xf32>
    %10 = vector.shape_cast %9 : vector<1x1x8xf32> to vector<1x8xf32>
    %11 = vector.broadcast %10 : vector<1x8xf32> to vector<8x8xf32>
    %12 = arith.addf %8, %11 : vector<8x8xf32>
    %cst_9 = arith.constant 0.353553385 : f32
    %13 = vector.broadcast %cst_9 : f32 to vector<8x8xf32>
    %14 = arith.mulf %12, %13 : vector<8x8xf32>
    %c0_10 = arith.constant 0 : index
    %c0_11 = arith.constant 0 : index
    %c0_12 = arith.constant 0 : index
    %15 = vector.load %arg4[%c0_10, %c0_11, %c0_12] : memref<1x32x8xbf16, #tpu.memory_space<vmem>>, vector<1x32x8xbf16>
    %16 = vector.shape_cast %15 : vector<1x32x8xbf16> to vector<32x8xbf16>
    %cst_13 = arith.constant dense<0.000000e+00> : vector<8x8xf32>
    %17 = tpu.matmul %5, %16, %cst_13 {dimension_numbers = #tpu.dot_dimension_numbers<[1], [0], [0], [1], [0, 0, 1, 1], [], []>} : vector<8x32xbf16>, vector<32x8xbf16>, vector<8x8xf32> -> vector<8x8xf32>
    %c0_14 = arith.constant 0 : index
    %c0_15 = arith.constant 0 : index
    %c0_16 = arith.constant 0 : index
    %18 = vector.load %arg5[%c0_14, %c0_15, %c0_16] : memref<1x32x8xbf16, #tpu.memory_space<vmem>>, vector<1x32x8xbf16>
    %19 = vector.shape_cast %18 : vector<1x32x8xbf16> to vector<32x8xbf16>
    %cst_17 = arith.constant dense<0.000000e+00> : vector<8x8xf32>
    %20 = tpu.matmul %5, %19, %cst_17 {dimension_numbers = #tpu.dot_dimension_numbers<[1], [0], [0], [1], [0, 0, 1, 1], [], []>} : vector<8x32xbf16>, vector<32x8xbf16>, vector<8x8xf32> -> vector<8x8xf32>
    %c0_18 = arith.constant 0 : index
    %c0_19 = arith.constant 0 : index
    %c0_20 = arith.constant 0 : index
    %21 = vector.load %arg7[%c0_18, %c0_19, %c0_20] : memref<1x1x8xf32, #tpu.memory_space<vmem>>, vector<1x1x8xf32>
    %22 = vector.shape_cast %21 : vector<1x1x8xf32> to vector<1x8xf32>
    %23 = vector.broadcast %22 : vector<1x8xf32> to vector<8x8xf32>
    %24 = arith.addf %20, %23 : vector<8x8xf32>
    %25 = arith.truncf %14 : vector<8x8xf32> to vector<8x8xbf16>
    %26 = arith.truncf %17 : vector<8x8xf32> to vector<8x8xbf16>
    %cst_21 = arith.constant dense<0.000000e+00> : vector<8x8xf32>
    %27 = tpu.matmul %25, %26, %cst_21 {dimension_numbers = #tpu.dot_dimension_numbers<[1], [1], [0], [0], [0, 0, 1, 0], [], []>} : vector<8x8xbf16>, vector<8x8xbf16>, vector<8x8xf32> -> vector<8x8xf32>
    %cst_22 = arith.constant dense<0xFF800000> : vector<8xf32>
    %28 = vector.multi_reduction <maximumf>, %27, %cst_22 [1] : vector<8x8xf32> to vector<8xf32>
    %29 = vector.shape_cast %28 : vector<8xf32> to vector<8x1xf32>
    %30 = vector.broadcast %29 : vector<8x1xf32> to vector<8x8xf32>
    %31 = arith.subf %27, %30 : vector<8x8xf32>
    %32 = math.exp %31 : vector<8x8xf32>
    %cst_23 = arith.constant dense<0.000000e+00> : vector<8xf32>
    %33 = vector.multi_reduction <add>, %32, %cst_23 [1] : vector<8x8xf32> to vector<8xf32>
    %34 = vector.shape_cast %33 : vector<8xf32> to vector<8x1xf32>
    %35 = arith.truncf %32 : vector<8x8xf32> to vector<8x8xbf16>
    %36 = arith.truncf %24 : vector<8x8xf32> to vector<8x8xbf16>
    %cst_24 = arith.constant dense<0.000000e+00> : vector<8x8xf32>
    %37 = tpu.matmul %35, %36, %cst_24 {dimension_numbers = #tpu.dot_dimension_numbers<[1], [0], [0], [1], [0, 0, 1, 1], [], []>} : vector<8x8xbf16>, vector<8x8xbf16>, vector<8x8xf32> -> vector<8x8xf32>
    %38 = tpu.reciprocal %34 {approx = true} : vector<8x1xf32> -> vector<8x1xf32>
    %39 = vector.broadcast %38 : vector<8x1xf32> to vector<8x8xf32>
    %40 = arith.mulf %37, %39 : vector<8x8xf32>
    %c0_25 = arith.constant 0 : index
    %c0_26 = arith.constant 0 : index
    %41 = vector.load %arg11[%c0_25, %c0_26] : memref<8x32xf32, #tpu.memory_space<vmem>>, vector<8x32xf32>
    %42 = arith.truncf %40 : vector<8x8xf32> to vector<8x8xbf16>
    %c0_27 = arith.constant 0 : index
    %c0_28 = arith.constant 0 : index
    %c0_29 = arith.constant 0 : index
    %43 = vector.load %arg8[%c0_27, %c0_28, %c0_29] : memref<1x8x32xbf16, #tpu.memory_space<vmem>>, vector<1x8x32xbf16>
    %44 = vector.shape_cast %43 : vector<1x8x32xbf16> to vector<8x32xbf16>
    %cst_30 = arith.constant dense<0.000000e+00> : vector<8x32xf32>
    %45 = tpu.matmul %42, %44, %cst_30 {dimension_numbers = #tpu.dot_dimension_numbers<[1], [0], [0], [1], [0, 0, 1, 1], [], []>} : vector<8x8xbf16>, vector<8x32xbf16>, vector<8x32xf32> -> vector<8x32xf32>
    %46 = arith.addf %41, %45 : vector<8x32xf32>
    %c0_31 = arith.constant 0 : index
    %c0_32 = arith.constant 0 : index
    %47 = vector.load %arg11[%c0_31, %c0_32] : memref<8x32xf32, #tpu.memory_space<vmem>>, vector<8x32xf32>
    tpu.vector_store %arg11[%c0_31, %c0_32], %46 {strides = array<i32>} : memref<8x32xf32, #tpu.memory_space<vmem>>, vector<8x32xf32>,
    %c3_i32 = arith.constant 3 : i32
    %48 = arith.cmpi eq, %arg1, %c3_i32 : i32
    %49 = arith.extui %48 : i1 to i32
    %c0_i32_33 = arith.constant 0 : i32
    %50 = arith.cmpi ne, %49, %c0_i32_33 : i32
    scf.if %50 {
      %c0_34 = arith.constant 0 : index
      %c0_35 = arith.constant 0 : index
      %51 = vector.load %arg11[%c0_34, %c0_35] : memref<8x32xf32, #tpu.memory_space<vmem>>, vector<8x32xf32>
      %c0_36 = arith.constant 0 : index
      %c0_37 = arith.constant 0 : index
      %c0_38 = arith.constant 0 : index
      %52 = vector.load %arg10[%c0_36, %c0_37, %c0_38] : memref<1x8x32xf32, #tpu.memory_space<vmem>>, vector<1x8x32xf32>
      %53 = vector.shape_cast %52 : vector<1x8x32xf32> to vector<8x32xf32>
      %54 = vector.shape_cast %51 : vector<8x32xf32> to vector<1x8x32xf32>
      tpu.vector_store %arg10[%c0_36, %c0_37, %c0_38], %54 {strides = array<i32>} : memref<1x8x32xf32, #tpu.memory_space<vmem>>, vector<1x8x32xf32>,
    } else {
    }
    return
  }
  func.func @transform_0(%arg0: i32, %arg1: i32) -> (i32, i32, i32) {
    %c0_i32 = arith.constant 0 : i32
    %c0_i32_0 = arith.constant 0 : i32
    %c0_i32_1 = arith.constant 0 : i32
    return %arg0, %c0_i32, %c0_i32_0 : i32, i32, i32
  }
  func.func @transform_1(%arg0: i32, %arg1: i32) -> (i32, i32, i32) {
    %c0_i32 = arith.constant 0 : i32
    %c0_i32_0 = arith.constant 0 : i32
    %c0_i32_1 = arith.constant 0 : i32
    return %arg1, %c0_i32, %c0_i32_0 : i32, i32, i32
  }
  func.func @transform_2(%arg0: i32, %arg1: i32) -> (i32, i32, i32) {
    %c0_i32 = arith.constant 0 : i32
    %c0_i32_0 = arith.constant 0 : i32
    %c0_i32_1 = arith.constant 0 : i32
    return %arg1, %c0_i32, %c0_i32_0 : i32, i32, i32
  }
  func.func @transform_3(%arg0: i32, %arg1: i32) -> (i32, i32, i32) {
    %c0_i32 = arith.constant 0 : i32
    %c0_i32_0 = arith.constant 0 : i32
    %c0_i32_1 = arith.constant 0 : i32
    return %arg1, %c0_i32, %c0_i32_0 : i32, i32, i32
  }
  func.func @transform_4(%arg0: i32, %arg1: i32) -> (i32, i32, i32) {
    %c0_i32 = arith.constant 0 : i32
    %c0_i32_0 = arith.constant 0 : i32
    %c0_i32_1 = arith.constant 0 : i32
    return %arg1, %c0_i32, %c0_i32_0 : i32, i32, i32
  }
  func.func @transform_5(%arg0: i32, %arg1: i32) -> (i32, i32, i32) {
    %c0_i32 = arith.constant 0 : i32
    %c0_i32_0 = arith.constant 0 : i32
    %c0_i32_1 = arith.constant 0 : i32
    return %arg1, %c0_i32, %c0_i32_0 : i32, i32, i32
  }
  func.func @transform_6(%arg0: i32, %arg1: i32) -> (i32, i32, i32) {
    %c0_i32 = arith.constant 0 : i32
    %c0_i32_0 = arith.constant 0 : i32
    %c0_i32_1 = arith.constant 0 : i32
    return %arg1, %c0_i32, %c0_i32_0 : i32, i32, i32
  }
  func.func @transform_7(%arg0: i32, %arg1: i32) -> (i32, i32) {
    %c0_i32 = arith.constant 0 : i32
    %c0_i32_0 = arith.constant 0 : i32
    %c0_i32_1 = arith.constant 0 : i32
    return %c0_i32, %c0_i32_0 : i32, i32
  }
  func.func @transform_8(%arg0: i32, %arg1: i32) -> (i32, i32, i32) {
    %c0_i32 = arith.constant 0 : i32
    %c0_i32_0 = arith.constant 0 : i32
    %c0_i32_1 = arith.constant 0 : i32
    return %arg0, %c0_i32, %c0_i32_0 : i32, i32, i32
  }
}

</mosaic_0001>

<bundles_post_ra>
// kernel: tpu_custom_call.1
= control target key start
LH: loop header
LB: loop body
LE: loop exit
PB: predicated region body
PF: predicated region fallthrough
CT: control target
= control target key end

     0   :  { %s1454_s0 = inlined_call_operand.vmem [shape: f32[2,8,32], index: 0, kind: input, shape index: {}]   ;;  %s1455_s1 = inlined_call_operand.vmem [shape: bf16[4,32,8], index: 1, kind: input, shape index: {}]   ;;  %s1456_s2 = inlined_call_operand.vmem [shape: bf16[4,32,8], index: 2, kind: input, shape index: {}]   ;;  %s1457_s3 = inlined_call_operand.vmem [shape: bf16[4,32,8], index: 3, kind: input, shape index: {}]   ;;  %s1458_s4 = inlined_call_operand.vmem [shape: f32[4,1,8], index: 4, kind: input, shape index: {}]   ;;  %s1459_s5 = inlined_call_operand.vmem [shape: f32[4,1,8], index: 5, kind: input, shape index: {}]   ;;  %s1460_s6 = inlined_call_operand.vmem [shape: bf16[4,8,32], index: 6, kind: input, shape index: {}]   ;;  %s1461_s7 = inlined_call_operand.vmem [shape: f32[1,32], index: 7, kind: input, shape index: {}]   ;;  %s1462_s8 = inlined_call_operand.hbm [shape: f32[2,8,32], index: 8, kind: output, shape index: {}]  }
   0x1   :  { %1473 = sst [smem:[#allocation15_spill]] %s1454_s0 }
   0x2   :  { %1474 = sst [smem:[#allocation16_spill]] %s1455_s1 }
   0x3   :  { %1475 = sst [smem:[#allocation17_spill]] %s1462_s8 }
   0x4   :  { %13 = vsyncpa [#allocation4], 0 }
   0x5   :  { %15 = vsyncpa [#allocation4 + $0x1], 0  ;;  %s1257_s27 = smov 0   ;;  %s1259_s28 = smov 0  }
   0x6   :  { %s1261_s29 = smov 0   ;;  %s1263_s30 = smov 0  }
   0x7   :  { %s1265_s9 = smov 0   ;;  %s1267_s10 = smov 0  }
   0x8   :  { %s1269_s11 = smov 0   ;;  %s1271_s12 = smov 0  }
   0x9 LB: > { %1476 = sst [smem:[#allocation6_spill]] %s1179_s27  ;;  %s937_s13 = sadd.s32 4294967295, %s1207_s12   ;;  %s1207_s12 = sphi %s1271_s12, %s21_s12   ;;  %s1203_s11 = sphi %s1269_s11, %s1499_s11   ;;  %s1199_s10 = sphi %s1267_s10, %s1498_s10   ;;  %s1195_s9 = sphi %s1265_s9, %s1497_s9   ;;  %s1191_s30 = sphi %s1263_s30, %s1496_s30   ;;  %s1187_s29 = sphi %s1261_s29, %s1495_s29   ;;  %s1183_s28 = sphi %s1259_s28, %s1501_s28   ;;  %s1179_s27 = sphi %s1257_s27, %s1500_s27  }
   0xa   : > { %1477 = sst [smem:[#allocation7_spill]] %s1187_s29  ;;  %s938_s14 = sadd.s32 4294967294, %s1207_s12  }
   0xb   : > { %1478 = sst [smem:[#allocation8_spill]] %s1199_s10  ;;  %s30_s15 = sadd.s32 1, %s1199_s10 }
   0xc   : > { %1479 = sst [smem:[#allocation9_spill]] %s1203_s11  ;;  %p31_p0 = scmp.ge.s32.totalorder %s30_s15, 4 }
   0xd   : > { %1480 = sst [smem:[#allocation10_spill]] %s1207_s12  ;;  %s33_s16 = sadd.s32 1, %s1203_s11 }
   0xe   : > { %p253_p1 = scmp.ne.s32.totalorder %s1187_s29, %s1183_s28  ;;  %p254_p2 = scmp.eq.s32.totalorder %s937_s13, 7 }
   0xf   : > { %s1503_s15 = smov (%p31_p0, %s30_s15), 0  ;;  %s1505_s16 = smov (!%p31_p0, %s33_s16), %s1203_s11 }
  0x10   : > { %1481 = sst [smem:[#allocation11_spill]] %s1503_s15  ;;  %p1306_p3 = por %p254_p2, %p253_p1 }
  0x11   : > { %p259_p4 = scmp.ne.s32.totalorder %s1183_s28, %s1179_s27  ;;  %p35_p5 = scmp.ge.s32.totalorder %s1505_s16, 2 }
  0x12   : > { %p260_p6 = scmp.eq.s32.totalorder %s938_s14, 7  ;;  %p941_p7 = scmp.ge.s32.totalorder %s1207_s12, 1 }
  0x13   : > { %p331_p8 = scmp.lt.s32.totalorder %s1207_s12, 9  ;;  %s1507_s16 = smov (%p35_p5, %s1505_s16), 0 }
  0x14   : > { %1483 = sst [smem:[#allocation12_spill]] %s1507_s16  ;;  %p1316_p9 = por %p260_p6, %p259_p4 }
  0x15   : > { %p332_p10 = pnand %p941_p7, %p331_p8  ;;  %s240_s19 = ssub.s32 %s1203_s11, %s1507_s16 }
  0x16   : > { %s1484_s18 = scalar_select %p1316_p9, 1, 0 }
  0x17   : > { %s243_s20 = sadd.s32 1, %s1187_s29  ;;  %p241_p11 = scmp.eq.s32.totalorder %s240_s19, 0 }
  0x18   : > { %1485 = sst [smem:[#allocation13_spill]] %s1484_s18  ;;  %335 = sbr.rel (%p332_p10) target bundleno = 1036 (0x40c), region = 52 }
  0x19   : > { %s1324_s21 = scalar_select %p241_p11, %s1187_s29, %s243_s20  }
  0x1a   : > { %s1464_s22 = sand.u32 (!%p332_p10), 1, %s1183_s28   ;;  %p389_p12 = scmp.lt.s32.totalorder (!%p332_p10), %s1195_s9, 1 }
  0x1b   : > { %1486 = sst [smem:[#allocation14_spill]] %s1324_s21  ;;  %s1330_s23 = sshll.u32 (!%p332_p10), %s1464_s22, 3 }
  0x1c   : > { %p393_p13 = scmp.lt.s32.totalorder (!%p332_p10), %s1191_s30, 3  ;;  %s1487_s0 = sld [smem:[#allocation15_spill]] (!%p332_p10) }
  0x1d   : > { %s390_s24 = scalar_select %p389_p12, %s1195_s9, 1 }
  0x1e   : > { %s1335_s25 = scalar_select %p393_p13, %s1191_s30, 3 }
  0x1f   : > { %s943_s26 = sshll.u32 %s390_s24, 3  ;;  %s1488_s1 = sld [smem:[#allocation16_spill]] }
  0x20   : > { %s972_s20 = sshll.u32 %s1335_s25, 4  ;;  %s410_s8 = scalar_lea.vmem %s1458_s4, %s1335_s25 }
  0x21   : > { %s402_s21 = scalar_lea.vmem %s1456_s2, %s972_s20  ;;  %s1350_s27 = scalar_lea.vmem %s1457_s3, %s972_s20 }
  0x22   : > { %s392_s19 = scalar_lea.vmem %s1487_s0, %s943_s26  ;;  %s413_s14 = scalar_lea.vmem %s1459_s5, %s1335_s25 }
  0x23   : > { %s950_s0 = sshll.u32 %s1335_s25, 2  ;;  %s388_s10 = scalar_lea.vmem [#allocation3], %s1330_s23 }
  0x24   : > { %p951_p0 = scmp.ne.s32.totalorder %s1191_s30, 0 }
  0x25   : > { %s397_s22 = scalar_lea.vmem %s1488_s1, %s972_s20  ;;  %s1364_s1 = scalar_lea.vmem %s1460_s6, %s950_s0 }
  0x26   : > { %422 = sbr.rel (%p951_p0) target bundleno = 45 (0x2d), region = 56 }
  0x2b   : > { %v952_v0 = vld [vmem:[%s1461_s7] ss:$0 sm:$0xff]  ;;  %vm430_vm0 = vcmask 261120  }
  0x2c   : > { %431 = vst.msk [vmem:[#allocation2] sm:$0xff] %vm430_vm0, %v952_v0 }
  0x2d PF: > { %v1105_v1 = vld [vmem:[%s397_s22 + $0x8] sm:$0xff]   ;;  %v1209_v2 = vmov 0.0   ;;  %v1107_v4 = vld [vmem:[%s397_s22] sm:$0xff]   ;;  %vm1210_vm1 = vmmov 0   ;;  %vm457_vm2 = vcmask 261120   ;;  %vm623_vm3 = vcmask 64512  }
  0x2e   : > { %990 = vmatprep.subr.bf16.mxu0 %v1209_v2  ;;  %998 = vmatprep.subr.bf16.mxu1 %v1209_v2  ;;  %v1106_v3 = vld [vmem:[%s402_s21 + $0x8] sm:$0xff]   ;;  %v1108_v5 = vld [vmem:[%s402_s21] sm:$0xff]   ;;  %vm684_vm4 = vcmask 1043456   ;;  %p967_p1 = scmp.ne.s32.totalorder %s1191_s30, 3 }
  0x2f   : > { %991 = vmatpush3.bf16.msra.mxu0 %v1105_v1  ;;  %994 = vmatprep.mubr.msk.bf16.mxu0 %vm1210_vm1, %v1209_v2  ;;  %v432_v6 = vld [vmem:[%s392_s19] sm:$0xff]  ;;  %v1109_v8 = vld [vmem:[%s1350_s27 + $0x8] sm:$0xff]  }
  0x30   : > { %999 = vmatpush3.bf16.msra.mxu1 %v1106_v3  ;;  %992 = vmatprep.subr.bf16.mxu0 %v1209_v2  ;;  %v433_v7 = vpack.c.bf16 %v432_v6, %v432_v6  ;;  %v1110_v9 = vld [vmem:[%s1350_s27] sm:$0xff]  }
  0x31   : > { %1000 = vmatprep.subr.bf16.mxu1 %v1209_v2  ;;  %1002 = vmatprep.mubr.msk.bf16.mxu1 %vm1210_vm1, %v1209_v2  ;;  %v953_v10 = vld [vmem:[%s410_s8] ss:$0 sm:$0xff] }
  0x32   : > { %v960_v29 = vld [vmem:[%s413_s14] ss:$0 sm:$0xff] }
  0x33   : > { %993 = vmatpush3.bf16.msra.mxu0 %v1107_v4  ;;  %v732_v43 = vld [vmem:[%s1364_s1] sm:$0xf] }
  0x34   : > { %1001 = vmatpush3.bf16.msra.mxu1 %v1108_v5  ;;  %1006 = vmatprep.subr.bf16.mxu0 %v1209_v2  ;;  %v737_v44 = vsel %vm684_vm4, %v732_v43, 0  ;;  %v730_v53 = vld [vmem:[#allocation2] sm:$0xff] }
  0x35   : > { %1014 = vmatprep.subr.bf16.mxu1 %v1209_v2 }
  0x36   : > { %995 = vmatmul.mubr.msk.bf16.vlgmr.msra.gmra.mxu0 %vm457_vm2, %v433_v7 }
  0x37   : > { %1003 = vmatmul.mubr.msk.bf16.vlgmr.msra.gmra.mxu1 %vm457_vm2, %v433_v7  ;;  %1010 = vmatprep.mubr.msk.bf16.mxu0 %vm1210_vm1, %v1209_v2 }
  0x38   : > { %1016 = vmatprep.mubr.msk.bf16.mxu1 %vm1210_vm1, %v1209_v2  ;;  %1007 = vmatpush3.bf16.msra.mxu0 %v1109_v8 }
  0x39   : > { %1008 = vmatprep.subr.bf16.mxu0 %v1209_v2 }
  0x3c   : > { %1009 = vmatpush3.bf16.msra.mxu0 %v1110_v9 }
  0x3d   : > { %1020 = vmatprep.subr.bf16.mxu0 %v1209_v2 }
  0x3f   : > { %1011 = vmatmul.mubr.msk.bf16.vlgmr.msra.gmra.mxu0 %vm457_vm2, %v433_v7 }
  0x40   : > { %1022 = vmatprep.mubr.msk.bf16.mxu0 %vm1210_vm1, %v1209_v2 }
  0xf6   : > { %v495_v11 = vpop.f32.mrf.mxu0 }
  0xf7   : > { %v496_v12 = vadd.f32 %v953_v10, %v495_v11  ;;  %v552_v13 = vpop.f32.mrf.mxu1 }
  0xf8   : > { %v622_v14 = vpack.c.bf16 %v552_v13, %v552_v13  ;;  %v996_v15 = vpop.f32.mrf.mxu0 }
  0xf9   : > { %v1004_v16 = vpop.f32.mrf.mxu1  ;;  %v501_v17 = vmul.f32 0.35355338, %v496_v12 }
  0xfa   : > { %v628_v18 = vsel %vm623_vm3, %v622_v14, 0  ;;  %v498_v19 = vpop.f32.mrf.mxu0 }
  0xfb   : > { %v555_v20 = vpop.f32.mrf.mxu1  ;;  %1015 = vmatpush3.bf16.xpose.msra.mxu1 %v628_v18  ;;  %v621_v23 = vpack.c.bf16 %v501_v17, %v501_v17 }
  0xfc   : > { %v997_v21 = vpop.f32.mrf.mxu0  ;;  %1026 = vmatprep.subr.bf16.mxu1 %v1209_v2 }
  0xfd   : > { %v1005_v22 = vpop.f32.mrf.mxu1 }
  0xff   : > { %v615_v30 = vpop.f32.mrf.mxu0 }
 0x100   : > { %v616_v31 = vadd.f32 %v960_v29, %v615_v30 }
 0x101   : > { %v1012_v32 = vpop.f32.mrf.mxu0 }
 0x102   : > { %1017 = vmatmul.mubr.msk.bf16.vlgmr.msra.gmra.mxu1 %vm623_vm3, %v621_v23  ;;  %v680_v33 = vpack.c.bf16 %v616_v31, %v616_v31 }
 0x103   : > { %1028 = vmatprep.mubr.msk.bf16.mxu1 %vm1210_vm1, %v1209_v2  ;;  %v618_v34 = vpop.f32.mrf.mxu0  ;;  %1027 = vmatpush3.bf16.msra.mxu1 %v737_v44 }
 0x104   : > { %v686_v35 = vsel %vm684_vm4, %v680_v33, 0 }
 0x105   : > { %v1013_v36 = vpop.f32.mrf.mxu0  ;;  %1021 = vmatpush3.bf16.msra.mxu0 %v686_v35 }
 0x1c2   : > { %v664_v24 = vpop.f32.mrf.mxu1 }
 0x1c3   : > { %v670_v25 = vsel %vm623_vm3, %v664_v24, -inf }
 0x1c4   : > { %671 = vmax.xlane.f32.xlu0 %v670_v25  ;;  %v1018_v26 = vpop.f32.mrf.mxu1 }
 0x1c6   : > { %v667_v27 = vpop.f32.mrf.mxu1 }
 0x1c8   : > { %v1019_v28 = vpop.f32.mrf.mxu1 }
 0x24d   : > { %v672_v37 = vpop.xlane.xlu0 %671 }
 0x24e   : > { %v673_v38 = vsub.f32 %v664_v24, %v672_v37 }
 0x250   : > { %v674_v39 = vmul.f32 1.442695, %v673_v38 }
 0x252   : > { %1111 = vpow2.f32 %v674_v39 }
 0x25f   : > { %v1112_v40 = vpop.eup %1111 }
 0x260   : > { %v676_v41 = vsel %vm623_vm3, %v1112_v40, 0.0  ;;  %v679_v42 = vpack.c.bf16 %v1112_v40, %v1112_v40 }
 0x261   : > { %677 = vadd.xlane.f32.xlu0 %v676_v41 }
 0x262   : > { %1023 = vmatmul.mubr.msk.bf16.vlgmr.msra.gmra.mxu0 %vm623_vm3, %v679_v42 }
 0x2ea   : > { %v678_v45 = vpop.xlane.xlu0 %677 }
 0x2eb   : > { %1113 = vrcp.f32 %v678_v45 }
 0x2f8   : > { %v1114_v46 = vpop.eup %1113 }
 0x322   : > { %v722_v47 = vpop.f32.mrf.mxu0 }
 0x323   : > { %v729_v48 = vmul.f32 %v1114_v46, %v722_v47 }
 0x324   : > { %v1024_v49 = vpop.f32.mrf.mxu0 }
 0x325   : > { %v731_v50 = vpack.c.bf16 %v729_v48, %v729_v48 }
 0x326   : > { %v725_v51 = vpop.f32.mrf.mxu0 }
 0x327   : > { %1029 = vmatmul.mubr.msk.bf16.vlgmr.msra.gmra.mxu1 %vm623_vm3, %v731_v50 }
 0x328   : > { %v1025_v52 = vpop.f32.mrf.mxu0 }
 0x3e7   : > { %v773_v54 = vpop.f32.mrf.mxu1 }
 0x3e8   : > { %v779_v55 = vadd.f32 %v773_v54, %v730_v53 }
 0x3e9   : > { %v1030_v56 = vpop.f32.mrf.mxu1  ;;  %784 = sbr.rel (%p967_p1) target bundleno = 1011 (0x3f3), region = 60 }
 0x3ea   : > { %780 = vst.msk [vmem:[#allocation2] sm:$0xff] %vm457_vm2, %v779_v55 }
 0x3eb   : > { %v776_v57 = vpop.f32.mrf.mxu1 }
 0x3ed   : > { %v1031_v58 = vpop.f32.mrf.mxu1 }
 0x3f1   : > { %v785_v59 = vld [vmem:[#allocation2] sm:$0xff] }
 0x3f2   : > { %786 = vst.msk [vmem:[%s388_s10] sm:$0xff] %vm457_vm2, %v785_v59 }
 0x3f3 PF: > { %s969_s1 = sshll.u32 %s1195_s9, 7  ;;  %s1489_s22 = sld [smem:[#allocation17_spill]] }
 0x3f4   : > { %s801_s19 = sshll.u32 %s388_s10, 4  ;;  %s1490_s30 = sand.u32 1, %s1183_s28   ;;  %s802_s19 = int_to_ptr.vmem [resolvable:$true] %s801_s19 }
 0x3f5   : > { %s788_s20 = scalar_lea.sflag [#allocation4], %s1490_s30  ;;  %s1115_s24 = scalar_lea.vmem %s802_s19, 128 }
 0x3f6   : > { %p1116_p2 = scmp.ne.s32.totalorder %s802_s19, %s1115_s24  ;;  %s1211_s13 = smov [#allocation3]  }
 0x3f7   : > { %s1119_s26 = sshll.u32 %s1211_s13, 4  ;;  %s1120_s26 = int_to_ptr.vmem [resolvable:$false] %s1119_s26 }
 0x3f8   : > { %p1117_p4 = pnand %p1116_p2, %p1306_p3  ;;  %s1121_s14 = scalar_lea.vmem %s1120_s26, 256 }
 0x3f9   : > { %s799_s25 = scalar_lea.hbm %s1489_s22, %s969_s1  ;;  %p1122_p6 = scmp.lt.s32.totalorder %s802_s19, %s1120_s26 }
 0x3fa   : > { %p1118_p5 = pneg %p1117_p4  ;;  %p1123_p7 = scmp.lt.s32.totalorder %s1121_s14, %s1115_s24 }
 0x3fc   : > { %p1124_p8 = por %p1123_p7, %p1122_p6 }
 0x3fe   : > { %p1125_p10 = pnand %p1124_p8, %p1118_p5 }
 0x400   : > { %1128 = shalt.err (!%p1125_p10)
}
 0x401   : > { %s1129_s9 = scalar_lea.hbm %s799_s25, 128  ;;  %s1133_s16 = scalar_lea.hbm %s1489_s22, 256 }
 0x402   : > { %p1130_p11 = scmp.ne.s32.totalorder %s799_s25, %s1129_s9  ;;  %p1134_p0 = scmp.lt.s32.totalorder %s799_s25, %s1489_s22 }
 0x403   : > { %p1135_p1 = scmp.lt.s32.totalorder %s1133_s16, %s1129_s9 }
 0x404   : > { %p1131_p12 = pnand %p1130_p11, %p1306_p3 }
 0x405   : > { %p1136_p2 = por %p1135_p1, %p1134_p0 }
 0x406   : > { %p1132_p13 = pneg %p1131_p12 }
 0x408   : > { %p1137_p4 = pnand %p1136_p2, %p1132_p13 }
 0x40a   : > { %1140 = shalt.err (!%p1137_p4)
}
 0x40b   : > { %1032 = dma.vmem_to_hbm [thread:$0]  (%p1306_p3), %s802_s19, 128, %s799_s25, %s788_s20  }
 0x40c PF: > { %s1491_s11 = sld [smem:[#allocation10_spill]] }
 0x40d   : > { %s1492_s0 = sld [smem:[#allocation6_spill]] }
 0x412   : > { %p1038_p5 = scmp.ge.s32.totalorder %s1491_s11, 2 }
 0x413   : > { %s813_s8 = sand.u32 1, %s1492_s0  }
 0x414   : > { %p1035_p6 = pnand %p1038_p5, %p1316_p9  ;;  %s814_s27 = scalar_lea.sflag [#allocation4], %s813_s8 }
 0x416   : > { %p1036_p7 = pneg %p1035_p6 }
 0x418   : > { %1174 = dma.done.wait (%p1036_p7), %s814_s27, 128  }
 0x419   : > { %1176 = vsyncadd (%p1036_p7), %s814_s27, 4294967168  ;;  %s21_s12 = sadd.s32 1, %s1491_s11   ;;  %s1494_s1 = sld [smem:[#allocation7_spill]] }
 0x41a   : > { %p18_p8 = scmp.ge.s32.totalorder %s21_s12, 10   ;;  %s1495_s29 = sld [smem:[#allocation14_spill]] }
 0x41b   : > { %s1496_s30 = sld [smem:[#allocation8_spill]]  ;;  %s1500_s27 = smov %s1183_s28 }
 0x41c   : > { %s1497_s9 = sld [smem:[#allocation9_spill]]  ;;  %20 = sbr.rel (!%p18_p8) target bundleno = 9 (0x9), region = 113 }
 0x41d   : > { %s1498_s10 = sld [smem:[#allocation11_spill]] }
 0x41e   : > { %s1499_s11 = sld [smem:[#allocation12_spill]] }
 0x41f   : > { %s1501_s28 = smov %s1494_s1 }
 0x421   :  { %819 = vsyncpa [#allocation4], 1 }
 0x422   :  { %821 = vsyncpa [#allocation4 + $0x1], 1 }

</bundles_post_ra>
